<compile_context>
chip_gen: v5e
topology: v5e:2x2
jax: 0.10.0
libtpu: 0.0.40
codegen_flags: <defaults>
</compile_context>

<pallas_src>
import jax
import jax.numpy as jnp
from jax.experimental import pallas as pl
from jax.experimental.pallas import tpu as pltpu


# ---------------------------------------------------------------------------
# Flat SMEM parameter layout (f32 scalars), row-major weights (in, out):
#   [ 0: 6]  W1 (2,3)   w1[i,j] at W1_OFF + i*3 + j
#   [ 6: 9]  b1 (3,)
#   [ 9:21]  W2 (3,4)   w2[j,k] at W2_OFF + j*4 + k
#   [21:25]  b2 (4,)
#   [25:33]  W3 (4,2)   w3[k,m] at W3_OFF + k*2 + m
#   [33:35]  b3 (2,)
#   [35:40]  zero padding
# ---------------------------------------------------------------------------
W1_OFF, B1_OFF = 0, 6
W2_OFF, B2_OFF = 9, 21
W3_OFF, B3_OFF = 25, 33
N_PARAMS = 40

D_IN, D_H1, D_H2, D_OUT = 2, 3, 4, 2


def mlp_kernel(p_ref, x_ref, o_ref):
    """p_ref: SMEM (N_PARAMS,) f32 scalars.
    x_ref:  VMEM (D_IN,  TILE_N) f32 -- features on sublanes, batch on lanes.
    o_ref:  VMEM (D_OUT, TILE_N) f32 -- lane-dense output slab.
    """
    # Input rows kept 2-D: (1, TILE_N) each.
    xin = [x_ref[i:i + 1, :] for i in range(D_IN)]

    # ---- layer 1: 2 -> 3, ReLU (scalar-operand VPU FMAs) ----
    h1 = []
    for j in range(D_H1):
        acc = xin[0] * p_ref[W1_OFF + 0 * D_H1 + j]
        acc = acc + xin[1] * p_ref[W1_OFF + 1 * D_H1 + j]
        acc = acc + p_ref[B1_OFF + j]
        h1.append(jnp.maximum(acc, 0.0))

    # ---- layer 2: 3 -> 4, tanh (tanh -> EUP slot) ----
    h2 = []
    for k in range(D_H2):
        acc = h1[0] * p_ref[W2_OFF + 0 * D_H2 + k]
        acc = acc + h1[1] * p_ref[W2_OFF + 1 * D_H2 + k]
        acc = acc + h1[2] * p_ref[W2_OFF + 2 * D_H2 + k]
        acc = acc + p_ref[B2_OFF + k]
        h2.append(jnp.tanh(acc))

    # ---- layer 3: 4 -> 2, lane-dense row stores ----
    for m in range(D_OUT):
        acc = h2[0] * p_ref[W3_OFF + 0 * D_OUT + m]
        acc = acc + h2[1] * p_ref[W3_OFF + 1 * D_OUT + m]
        acc = acc + h2[2] * p_ref[W3_OFF + 2 * D_OUT + m]
        acc = acc + h2[3] * p_ref[W3_OFF + 3 * D_OUT + m]
        acc = acc + p_ref[B3_OFF + m]
        o_ref[m:m + 1, :] = acc.astype(o_ref.dtype)


def pack_params(params):
    """Pack (in,out) weights and (out,) biases into one flat f32 SMEM array."""
    flat = jnp.zeros((N_PARAMS,), jnp.float32)
    flat = flat.at[W1_OFF:W1_OFF + 6].set(params["w1"].reshape(-1))
    flat = flat.at[B1_OFF:B1_OFF + 3].set(params["b1"])
    flat = flat.at[W2_OFF:W2_OFF + 12].set(params["w2"].reshape(-1))
    flat = flat.at[B2_OFF:B2_OFF + 4].set(params["b2"])
    flat = flat.at[W3_OFF:W3_OFF + 8].set(params["w3"].reshape(-1))
    flat = flat.at[B3_OFF:B3_OFF + 2].set(params["b3"])
    return flat


def _round_up(x, m):
    return ((x + m - 1) // m) * m


def mlp_forward(x1, flat_params, *, max_tile_n=4096):
    """x1: (B, S, 2) f32; flat_params: (N_PARAMS,) f32 packed scalars."""
    B, S, d_in = x1.shape
    assert d_in == D_IN
    N = B * S

    # Lane-dense layout: batch on the 128-lane axis, padded to the tile.
    lanes = max(128, _round_up(N, 128))
    tile_n = min(lanes, max_tile_n)
    n_pad = _round_up(lanes, tile_n)
    grid = (n_pad // tile_n,)

    xt = jnp.zeros((D_IN, n_pad), jnp.float32)
    xt = xt.at[:, :N].set(x1.reshape(N, D_IN).astype(jnp.float32).T)

    cost = pl.CostEstimate(
        flops=n_pad * (2 * D_IN * D_H1 + 2 * D_H1 * D_H2 + 2 * D_H2 * D_OUT
                       + D_H1),                       # FMAs + ReLU
        transcendentals=n_pad * D_H2,                 # tanh
        bytes_accessed=(D_IN + D_OUT) * n_pad * 4 + N_PARAMS * 4,
    )

    out_t = pl.pallas_call(
        mlp_kernel,
        out_shape=jax.ShapeDtypeStruct((D_OUT, n_pad), jnp.float32),
        grid=grid,
        in_specs=[
            pl.BlockSpec(memory_space=pltpu.MemorySpace.SMEM),   # scalar params
            pl.BlockSpec((D_IN, tile_n), lambda i: (0, i)),      # lane-dense x^T
        ],
        out_specs=pl.BlockSpec((D_OUT, tile_n), lambda i: (0, i)),
        compiler_params=pltpu.CompilerParams(
            dimension_semantics=("parallel",)),
        cost_estimate=cost,
    )(flat_params, xt)

    return out_t[:, :N].T.reshape(B, S, D_OUT)


def init_params(key):
    """Deterministic init matching nn.Linear fan-in bounds.

    PyTorch stores Linear weight as (out, in); we transpose to (in, out) so
    the forward is x @ W + b.
    """
    dims = [(3, 2), (4, 3), (2, 4)]  # (out, in) for linear_1/2/3
    params = {}
    for idx, (dout, din) in enumerate(dims, start=1):
        key, kw, kb = jax.random.split(key, 3)
        bound = 1.0 / jnp.sqrt(din)
        w = jax.random.uniform(kw, (dout, din), jnp.float32, -bound, bound)
        b = jax.random.uniform(kb, (dout,), jnp.float32, -bound, bound)
        params[f"w{idx}"] = jnp.asarray(w.T)   # (in, out)
        params[f"b{idx}"] = jnp.asarray(b)     # (out,)
    return params


def reference_forward(x1, params):
    """Pure-JAX reference mirroring the PyTorch forward."""
    B, S, D = x1.shape
    x = x1.reshape(B * S, D)
    h = jnp.maximum(x @ params["w1"] + params["b1"], 0.0)
    h = jnp.tanh(h @ params["w2"] + params["b2"])
    h = h @ params["w3"] + params["b3"]
    return h.reshape(B, S, -1)


if __name__ == "__main__":
    key = jax.random.PRNGKey(0)
    key, kx = jax.random.split(key)

    # Matches the PyTorch example input x1 = torch.randn(1, 2, 2)
    x1 = jax.random.normal(kx, (1, 2, 2), jnp.float32)
    params = init_params(key)
    flat_params = pack_params(params)

    out = mlp_forward(x1, flat_params)
    jax.block_until_ready(out)

    ref = reference_forward(x1, params)
    assert out.shape == (1, 2, 2), out.shape
    assert jnp.allclose(out, ref, atol=1e-5, rtol=1e-5), (out, ref)

    print("KERNEL_OK")
</pallas_src>

<mosaic_0001>
module attributes {stable_mosaic.version = 11 : i64} {
  func.func @mlp_kernel(%arg0: i32, %arg1: memref<40xf32, #tpu.memory_space<smem>>, %arg2: memref<2x128xf32, #tpu.memory_space<vmem>>, %arg3: memref<2x128xf32, #tpu.memory_space<vmem>>) attributes {dimension_semantics = [#tpu.dimension_semantics<parallel>], iteration_bounds = array<i64: 1>, scalar_prefetch = 0 : i64, scratch_operands = 0 : i64, tpu.core_type = #tpu.core_type<tc>, window_params = [{transform_indices = @transform_0, window_bounds = array<i64: 40>}, {transform_indices = @transform_1, window_bounds = array<i64: 2, 128>}, {transform_indices = @transform_2, window_bounds = array<i64: 2, 128>}]} {
    %c0 = arith.constant 0 : index
    %c0_0 = arith.constant 0 : index
    %0 = vector.load %arg2[%c0, %c0_0] : memref<2x128xf32, #tpu.memory_space<vmem>>, vector<1x128xf32>
    %c1 = arith.constant 1 : index
    %c0_1 = arith.constant 0 : index
    %1 = vector.load %arg2[%c1, %c0_1] : memref<2x128xf32, #tpu.memory_space<vmem>>, vector<1x128xf32>
    %c0_2 = arith.constant 0 : index
    %2 = memref.load %arg1[%c0_2] : memref<40xf32, #tpu.memory_space<smem>>
    %3 = vector.broadcast %2 : f32 to vector<1x128xf32>
    %4 = arith.mulf %0, %3 : vector<1x128xf32>
    %c3 = arith.constant 3 : index
    %5 = memref.load %arg1[%c3] : memref<40xf32, #tpu.memory_space<smem>>
    %6 = vector.broadcast %5 : f32 to vector<1x128xf32>
    %7 = arith.mulf %1, %6 : vector<1x128xf32>
    %8 = arith.addf %4, %7 : vector<1x128xf32>
    %c6 = arith.constant 6 : index
    %9 = memref.load %arg1[%c6] : memref<40xf32, #tpu.memory_space<smem>>
    %10 = vector.broadcast %9 : f32 to vector<1x128xf32>
    %11 = arith.addf %8, %10 : vector<1x128xf32>
    %cst = arith.constant 0.000000e+00 : f32
    %12 = vector.broadcast %cst : f32 to vector<1x128xf32>
    %13 = arith.maximumf %11, %12 : vector<1x128xf32>
    %c1_3 = arith.constant 1 : index
    %14 = memref.load %arg1[%c1_3] : memref<40xf32, #tpu.memory_space<smem>>
    %15 = vector.broadcast %14 : f32 to vector<1x128xf32>
    %16 = arith.mulf %0, %15 : vector<1x128xf32>
    %c4 = arith.constant 4 : index
    %17 = memref.load %arg1[%c4] : memref<40xf32, #tpu.memory_space<smem>>
    %18 = vector.broadcast %17 : f32 to vector<1x128xf32>
    %19 = arith.mulf %1, %18 : vector<1x128xf32>
    %20 = arith.addf %16, %19 : vector<1x128xf32>
    %c7 = arith.constant 7 : index
    %21 = memref.load %arg1[%c7] : memref<40xf32, #tpu.memory_space<smem>>
    %22 = vector.broadcast %21 : f32 to vector<1x128xf32>
    %23 = arith.addf %20, %22 : vector<1x128xf32>
    %cst_4 = arith.constant 0.000000e+00 : f32
    %24 = vector.broadcast %cst_4 : f32 to vector<1x128xf32>
    %25 = arith.maximumf %23, %24 : vector<1x128xf32>
    %c2 = arith.constant 2 : index
    %26 = memref.load %arg1[%c2] : memref<40xf32, #tpu.memory_space<smem>>
    %27 = vector.broadcast %26 : f32 to vector<1x128xf32>
    %28 = arith.mulf %0, %27 : vector<1x128xf32>
    %c5 = arith.constant 5 : index
    %29 = memref.load %arg1[%c5] : memref<40xf32, #tpu.memory_space<smem>>
    %30 = vector.broadcast %29 : f32 to vector<1x128xf32>
    %31 = arith.mulf %1, %30 : vector<1x128xf32>
    %32 = arith.addf %28, %31 : vector<1x128xf32>
    %c8 = arith.constant 8 : index
    %33 = memref.load %arg1[%c8] : memref<40xf32, #tpu.memory_space<smem>>
    %34 = vector.broadcast %33 : f32 to vector<1x128xf32>
    %35 = arith.addf %32, %34 : vector<1x128xf32>
    %cst_5 = arith.constant 0.000000e+00 : f32
    %36 = vector.broadcast %cst_5 : f32 to vector<1x128xf32>
    %37 = arith.maximumf %35, %36 : vector<1x128xf32>
    %c9 = arith.constant 9 : index
    %38 = memref.load %arg1[%c9] : memref<40xf32, #tpu.memory_space<smem>>
    %39 = vector.broadcast %38 : f32 to vector<1x128xf32>
    %40 = arith.mulf %13, %39 : vector<1x128xf32>
    %c13 = arith.constant 13 : index
    %41 = memref.load %arg1[%c13] : memref<40xf32, #tpu.memory_space<smem>>
    %42 = vector.broadcast %41 : f32 to vector<1x128xf32>
    %43 = arith.mulf %25, %42 : vector<1x128xf32>
    %44 = arith.addf %40, %43 : vector<1x128xf32>
    %c17 = arith.constant 17 : index
    %45 = memref.load %arg1[%c17] : memref<40xf32, #tpu.memory_space<smem>>
    %46 = vector.broadcast %45 : f32 to vector<1x128xf32>
    %47 = arith.mulf %37, %46 : vector<1x128xf32>
    %48 = arith.addf %44, %47 : vector<1x128xf32>
    %c21 = arith.constant 21 : index
    %49 = memref.load %arg1[%c21] : memref<40xf32, #tpu.memory_space<smem>>
    %50 = vector.broadcast %49 : f32 to vector<1x128xf32>
    %51 = arith.addf %48, %50 : vector<1x128xf32>
    %52 = math.tanh %51 : vector<1x128xf32>
    %c10 = arith.constant 10 : index
    %53 = memref.load %arg1[%c10] : memref<40xf32, #tpu.memory_space<smem>>
    %54 = vector.broadcast %53 : f32 to vector<1x128xf32>
    %55 = arith.mulf %13, %54 : vector<1x128xf32>
    %c14 = arith.constant 14 : index
    %56 = memref.load %arg1[%c14] : memref<40xf32, #tpu.memory_space<smem>>
    %57 = vector.broadcast %56 : f32 to vector<1x128xf32>
    %58 = arith.mulf %25, %57 : vector<1x128xf32>
    %59 = arith.addf %55, %58 : vector<1x128xf32>
    %c18 = arith.constant 18 : index
    %60 = memref.load %arg1[%c18] : memref<40xf32, #tpu.memory_space<smem>>
    %61 = vector.broadcast %60 : f32 to vector<1x128xf32>
    %62 = arith.mulf %37, %61 : vector<1x128xf32>
    %63 = arith.addf %59, %62 : vector<1x128xf32>
    %c22 = arith.constant 22 : index
    %64 = memref.load %arg1[%c22] : memref<40xf32, #tpu.memory_space<smem>>
    %65 = vector.broadcast %64 : f32 to vector<1x128xf32>
    %66 = arith.addf %63, %65 : vector<1x128xf32>
    %67 = math.tanh %66 : vector<1x128xf32>
    %c11 = arith.constant 11 : index
    %68 = memref.load %arg1[%c11] : memref<40xf32, #tpu.memory_space<smem>>
    %69 = vector.broadcast %68 : f32 to vector<1x128xf32>
    %70 = arith.mulf %13, %69 : vector<1x128xf32>
    %c15 = arith.constant 15 : index
    %71 = memref.load %arg1[%c15] : memref<40xf32, #tpu.memory_space<smem>>
    %72 = vector.broadcast %71 : f32 to vector<1x128xf32>
    %73 = arith.mulf %25, %72 : vector<1x128xf32>
    %74 = arith.addf %70, %73 : vector<1x128xf32>
    %c19 = arith.constant 19 : index
    %75 = memref.load %arg1[%c19] : memref<40xf32, #tpu.memory_space<smem>>
    %76 = vector.broadcast %75 : f32 to vector<1x128xf32>
    %77 = arith.mulf %37, %76 : vector<1x128xf32>
    %78 = arith.addf %74, %77 : vector<1x128xf32>
    %c23 = arith.constant 23 : index
    %79 = memref.load %arg1[%c23] : memref<40xf32, #tpu.memory_space<smem>>
    %80 = vector.broadcast %79 : f32 to vector<1x128xf32>
    %81 = arith.addf %78, %80 : vector<1x128xf32>
    %82 = math.tanh %81 : vector<1x128xf32>
    %c12 = arith.constant 12 : index
    %83 = memref.load %arg1[%c12] : memref<40xf32, #tpu.memory_space<smem>>
    %84 = vector.broadcast %83 : f32 to vector<1x128xf32>
    %85 = arith.mulf %13, %84 : vector<1x128xf32>
    %c16 = arith.constant 16 : index
    %86 = memref.load %arg1[%c16] : memref<40xf32, #tpu.memory_space<smem>>
    %87 = vector.broadcast %86 : f32 to vector<1x128xf32>
    %88 = arith.mulf %25, %87 : vector<1x128xf32>
    %89 = arith.addf %85, %88 : vector<1x128xf32>
    %c20 = arith.constant 20 : index
    %90 = memref.load %arg1[%c20] : memref<40xf32, #tpu.memory_space<smem>>
    %91 = vector.broadcast %90 : f32 to vector<1x128xf32>
    %92 = arith.mulf %37, %91 : vector<1x128xf32>
    %93 = arith.addf %89, %92 : vector<1x128xf32>
    %c24 = arith.constant 24 : index
    %94 = memref.load %arg1[%c24] : memref<40xf32, #tpu.memory_space<smem>>
    %95 = vector.broadcast %94 : f32 to vector<1x128xf32>
    %96 = arith.addf %93, %95 : vector<1x128xf32>
    %97 = math.tanh %96 : vector<1x128xf32>
    %c25 = arith.constant 25 : index
    %98 = memref.load %arg1[%c25] : memref<40xf32, #tpu.memory_space<smem>>
    %99 = vector.broadcast %98 : f32 to vector<1x128xf32>
    %100 = arith.mulf %52, %99 : vector<1x128xf32>
    %c27 = arith.constant 27 : index
    %101 = memref.load %arg1[%c27] : memref<40xf32, #tpu.memory_space<smem>>
    %102 = vector.broadcast %101 : f32 to vector<1x128xf32>
    %103 = arith.mulf %67, %102 : vector<1x128xf32>
    %104 = arith.addf %100, %103 : vector<1x128xf32>
    %c29 = arith.constant 29 : index
    %105 = memref.load %arg1[%c29] : memref<40xf32, #tpu.memory_space<smem>>
    %106 = vector.broadcast %105 : f32 to vector<1x128xf32>
    %107 = arith.mulf %82, %106 : vector<1x128xf32>
    %108 = arith.addf %104, %107 : vector<1x128xf32>
    %c31 = arith.constant 31 : index
    %109 = memref.load %arg1[%c31] : memref<40xf32, #tpu.memory_space<smem>>
    %110 = vector.broadcast %109 : f32 to vector<1x128xf32>
    %111 = arith.mulf %97, %110 : vector<1x128xf32>
    %112 = arith.addf %108, %111 : vector<1x128xf32>
    %c33 = arith.constant 33 : index
    %113 = memref.load %arg1[%c33] : memref<40xf32, #tpu.memory_space<smem>>
    %114 = vector.broadcast %113 : f32 to vector<1x128xf32>
    %115 = arith.addf %112, %114 : vector<1x128xf32>
    %c0_6 = arith.constant 0 : index
    %c0_7 = arith.constant 0 : index
    %116 = vector.load %arg3[%c0_6, %c0_7] : memref<2x128xf32, #tpu.memory_space<vmem>>, vector<1x128xf32>
    tpu.vector_store %arg3[%c0_6, %c0_7], %115 {strides = array<i32>} : memref<2x128xf32, #tpu.memory_space<vmem>>, vector<1x128xf32>,
    %c26 = arith.constant 26 : index
    %117 = memref.load %arg1[%c26] : memref<40xf32, #tpu.memory_space<smem>>
    %118 = vector.broadcast %117 : f32 to vector<1x128xf32>
    %119 = arith.mulf %52, %118 : vector<1x128xf32>
    %c28 = arith.constant 28 : index
    %120 = memref.load %arg1[%c28] : memref<40xf32, #tpu.memory_space<smem>>
    %121 = vector.broadcast %120 : f32 to vector<1x128xf32>
    %122 = arith.mulf %67, %121 : vector<1x128xf32>
    %123 = arith.addf %119, %122 : vector<1x128xf32>
    %c30 = arith.constant 30 : index
    %124 = memref.load %arg1[%c30] : memref<40xf32, #tpu.memory_space<smem>>
    %125 = vector.broadcast %124 : f32 to vector<1x128xf32>
    %126 = arith.mulf %82, %125 : vector<1x128xf32>
    %127 = arith.addf %123, %126 : vector<1x128xf32>
    %c32 = arith.constant 32 : index
    %128 = memref.load %arg1[%c32] : memref<40xf32, #tpu.memory_space<smem>>
    %129 = vector.broadcast %128 : f32 to vector<1x128xf32>
    %130 = arith.mulf %97, %129 : vector<1x128xf32>
    %131 = arith.addf %127, %130 : vector<1x128xf32>
    %c34 = arith.constant 34 : index
    %132 = memref.load %arg1[%c34] : memref<40xf32, #tpu.memory_space<smem>>
    %133 = vector.broadcast %132 : f32 to vector<1x128xf32>
    %134 = arith.addf %131, %133 : vector<1x128xf32>
    %c1_8 = arith.constant 1 : index
    %c0_9 = arith.constant 0 : index
    %135 = vector.load %arg3[%c1_8, %c0_9] : memref<2x128xf32, #tpu.memory_space<vmem>>, vector<1x128xf32>
    tpu.vector_store %arg3[%c1_8, %c0_9], %134 {strides = array<i32>} : memref<2x128xf32, #tpu.memory_space<vmem>>, vector<1x128xf32>,
    return
  }
  func.func @transform_0(%arg0: i32) -> i32 {
    %c0_i32 = arith.constant 0 : i32
    %c0_i32_0 = arith.constant 0 : i32
    return %c0_i32 : i32
  }
  func.func @transform_1(%arg0: i32) -> (i32, i32) {
    %c0_i32 = arith.constant 0 : i32
    %c0_i32_0 = arith.constant 0 : i32
    return %c0_i32, %arg0 : i32, i32
  }
  func.func @transform_2(%arg0: i32) -> (i32, i32) {
    %c0_i32 = arith.constant 0 : i32
    %c0_i32_0 = arith.constant 0 : i32
    return %c0_i32, %arg0 : i32, i32
  }
}

</mosaic_0001>

<bundles_post_ra>
// kernel: tpu_custom_call.1
= control target key start
LH: loop header
LB: loop body
LE: loop exit
PB: predicated region body
PF: predicated region fallthrough
CT: control target
= control target key end

     0   :  { %7 = vsyncpa [#allocation5], 0  ;;  %s355_s0 = inlined_call_operand.hbm [shape: f32[40], index: 0, kind: input, shape index: {}]   ;;  %s356_s1 = inlined_call_operand.hbm [shape: f32[2,128], index: 1, kind: input, shape index: {}]   ;;  %s357_s2 = inlined_call_operand.hbm [shape: f32[2,128], index: 2, kind: output, shape index: {}]  }
   0x1   :  { %8 = vsyncpa [#allocation3], 0 }
   0x2   :  { %9 = vsyncpa [#allocation4], 0  ;;  %s15_s11 = sshll.u32 %s355_s0, 4  ;;  %s24_s14 = sshll.u32 %s356_s1, 4  ;;  %s16_s11 = int_to_ptr.hbm [resolvable:$true] %s15_s11  ;;  %s25_s14 = int_to_ptr.hbm [resolvable:$true] %s24_s14 }
   0x3   :  { %s301_s15 = smov [#allocation2]   ;;  %s302_s16 = smov [#allocation6]  }
   0x4   :  { %18 = dma.hbm_to_smem %s16_s11, 16, %s301_s15, [#allocation5]  }
   0x5   :  { %s26_s17 = sshll.u32 %s302_s16, 4  ;;  %s27_s17 = int_to_ptr.vmem [resolvable:$true] %s26_s17 }
   0x6   :  { %29 = dma.hbm_to_vmem [thread:$0]  %s25_s14, 32, %s27_s17, [#allocation3]  }
   0x7   :  { %295 = dma.done.wait [#allocation5], 16  }
   0x8   :  { %296 = vsyncadd [#allocation5], 4294967280 }
   0x9   :  { %297 = dma.done.wait [#allocation3], 32  }
   0xa   :  { %298 = vsyncadd [#allocation3], 4294967264 }
   0xb   :  { %38 = sfence }
   0xc   :  { %s41_s18 = sld [smem:[#allocation2]]  ;;  %v39_v0 = vld [vmem:[#allocation6] sm:$0x1]  ;;  %v40_v1 = vld [vmem:[#allocation6 + $0x1] sm:$0x1] }
   0xd   :  { %s190_s19 = sld [smem:[#allocation2 + $0x3]] }
   0xe   :  { %s191_s0 = sld [smem:[#allocation2 + $0x6]] }
   0xf   :  { %s192_s20 = sld [smem:[#allocation2 + $0x1]] }
  0x10   :  { %s193_s21 = sld [smem:[#allocation2 + $0x4]] }
  0x11   :  { %s194_s1 = sld [smem:[#allocation2 + $0x7]] }
  0x12   :  { %v42_v2 = vstv %s41_s18  ;;  %s195_s22 = sld [smem:[#allocation2 + $0x2]] }
  0x13   :  { %v43_v3 = vmul.f32 %v42_v2, %v39_v0  ;;  %v45_v4 = vstv %s190_s19  ;;  %s196_s23 = sld [smem:[#allocation2 + $0x5]] }
  0x14   :  { %v46_v5 = vmul.f32 %v45_v4, %v40_v1  ;;  %s325_s24 = sld [smem:[#allocation2 + $0x8]]  ;;  %v49_v6 = vstv %s191_s0 }
  0x15   :  { %v53_v7 = vstv %s192_s20  ;;  %s198_s25 = sld [smem:[#allocation2 + $0x9]] }
  0x16   :  { %v47_v8 = vadd.f32 %v46_v5, %v43_v3  ;;  %v54_v9 = vmul.f32 %v53_v7, %v39_v0  ;;  %v56_v10 = vstv %s193_s21  ;;  %s199_s26 = sld [smem:[#allocation2 + $0xd]] }
  0x17   :  { %v57_v11 = vmul.f32 %v56_v10, %v40_v1  ;;  %s327_s27 = sld [smem:[#allocation2 + $0x11]]  ;;  %v60_v13 = vstv %s194_s1  ;;  %s303_s1 = smov [#allocation7]  }
  0x18   :  { %v50_v12 = vadd.f32 %v49_v6, %v47_v8  ;;  %v64_v14 = vstv %s195_s22  ;;  %s329_s28 = sld [smem:[#allocation2 + $0x15]]  ;;  %s177_s22 = sshll.u32 %s303_s1, 4  ;;  %s178_s22 = int_to_ptr.vmem [resolvable:$true] %s177_s22 }
  0x19   :  { %v58_v15 = vadd.f32 %v57_v11, %v54_v9  ;;  %v65_v16 = vmul.f32 %v64_v14, %v39_v0  ;;  %v67_v17 = vstv %s196_s23  ;;  %s202_s29 = sld [smem:[#allocation2 + $0xa]] }
  0x1a   :  { %v51_v18 = vmax.f32 %v50_v12, 0.0  ;;  %v68_v19 = vmul.f32 %v67_v17, %v40_v1  ;;  %s203_s30 = sld [smem:[#allocation2 + $0xe]]  ;;  %v71_v21 = vstv %s325_s24 }
  0x1b   :  { %v61_v20 = vadd.f32 %v60_v13, %v58_v15  ;;  %v75_v22 = vstv %s198_s25  ;;  %s204_s3 = sld [smem:[#allocation2 + $0x12]]  ;;  %s179_s25 = sshll.u32 %s357_s2, 4  ;;  %s180_s25 = int_to_ptr.hbm [resolvable:$true] %s179_s25 }
  0x1c   :  { %v69_v23 = vadd.f32 %v68_v19, %v65_v16  ;;  %v78_v24 = vstv %s199_s26  ;;  %s332_s4 = sld [smem:[#allocation2 + $0x16]]  ;;  %v76_v26 = vmul.f32 %v75_v22, %v51_v18 }
  0x1d   :  { %v62_v25 = vmax.f32 %v61_v20, 0.0  ;;  %s206_s5 = sld [smem:[#allocation2 + $0xb]]  ;;  %v82_v29 = vstv %s327_s27 }
  0x1e   :  { %v72_v27 = vadd.f32 %v71_v21, %v69_v23  ;;  %s207_s6 = sld [smem:[#allocation2 + $0xf]]  ;;  %v86_v39 = vstv %s329_s28 }
  0x1f   :  { %v79_v28 = vmul.f32 %v78_v24, %v62_v25  ;;  %v90_v30 = vstv %s202_s29  ;;  %s208_s7 = sld [smem:[#allocation2 + $0x13]] }
  0x20   :  { %v73_v31 = vmax.f32 %v72_v27, 0.0  ;;  %v91_v32 = vmul.f32 %v90_v30, %v51_v18  ;;  %v93_v33 = vstv %s203_s30  ;;  %s335_s8 = sld [smem:[#allocation2 + $0x17]] }
  0x21   :  { %v80_v34 = vadd.f32 %v79_v28, %v76_v26  ;;  %v94_v35 = vmul.f32 %v93_v33, %v62_v25  ;;  %v97_v36 = vstv %s204_s3  ;;  %s210_s9 = sld [smem:[#allocation2 + $0xc]] }
  0x22   :  { %v83_v37 = vmul.f32 %v82_v29, %v73_v31  ;;  %v98_v38 = vmul.f32 %v97_v36, %v73_v31  ;;  %s211_s10 = sld [smem:[#allocation2 + $0x10]]  ;;  %v101_v43 = vstv %s332_s4 }
  0x23   :  { %v95_v40 = vadd.f32 %v94_v35, %v91_v32  ;;  %v105_v41 = vstv %s206_s5  ;;  %s212_s11 = sld [smem:[#allocation2 + $0x14]] }
  0x24   :  { %v84_v42 = vadd.f32 %v83_v37, %v80_v34  ;;  %v106_v44 = vmul.f32 %v105_v41, %v51_v18  ;;  %v108_v45 = vstv %s207_s6  ;;  %s339_s12 = sld [smem:[#allocation2 + $0x18]] }
  0x25   :  { %v99_v46 = vadd.f32 %v98_v38, %v95_v40  ;;  %v109_v47 = vmul.f32 %v108_v45, %v62_v25  ;;  %v112_v48 = vstv %s208_s7  ;;  %s341_s13 = sld [smem:[#allocation2 + $0x19]] }
  0x26   :  { %v87_v49 = vadd.f32 %v86_v39, %v84_v42  ;;  %v113_v50 = vmul.f32 %v112_v48, %v73_v31  ;;  %s215_s14 = sld [smem:[#allocation2 + $0x1b]]  ;;  %v116_v54 = vstv %s335_s8 }
  0x27   :  { %v102_v51 = vadd.f32 %v101_v43, %v99_v46  ;;  %v110_v52 = vadd.f32 %v109_v47, %v106_v44  ;;  %v120_v53 = vstv %s210_s9  ;;  %s344_s15 = sld [smem:[#allocation2 + $0x1d]] }
  0x28   :  { %227 = vtanh.f32 %v87_v49  ;;  %v121_v55 = vmul.f32 %v120_v53, %v51_v18  ;;  %v123_v56 = vstv %s211_s10  ;;  %s346_s16 = sld [smem:[#allocation2 + $0x1f]] }
  0x29   :  { %229 = vtanh.f32 %v102_v51  ;;  %v114_v57 = vadd.f32 %v113_v50, %v110_v52  ;;  %v124_v58 = vmul.f32 %v123_v56, %v62_v25  ;;  %v127_v59 = vstv %s212_s11  ;;  %s219_s17 = sld [smem:[#allocation2 + $0x1a]] }
  0x2a   :  { %v128_v60 = vmul.f32 %v127_v59, %v73_v31  ;;  %s220_s18 = sld [smem:[#allocation2 + $0x1c]]  ;;  %v131_v63 = vstv %s339_s12 }
  0x2b   :  { %v117_v61 = vadd.f32 %v116_v54, %v114_v57  ;;  %v125_v62 = vadd.f32 %v124_v58, %v121_v55  ;;  %v135_v0 = vstv %s341_s13  ;;  %s221_s19 = sld [smem:[#allocation2 + $0x1e]] }
  0x2c   :  { %v138_v2 = vstv %s215_s14  ;;  %s222_s0 = sld [smem:[#allocation2 + $0x20]] }
  0x2d   :  { %231 = vtanh.f32 %v117_v61  ;;  %v129_v1 = vadd.f32 %v128_v60, %v125_v62  ;;  %s218_s20 = sld [smem:[#allocation2 + $0x21]]  ;;  %v142_v9 = vstv %s344_s15 }
  0x2e   :  { %v228_v3 = vpop.eup %227  ;;  %s223_s21 = sld [smem:[#allocation2 + $0x22]]  ;;  %v146_v19 = vstv %s346_s16 }
  0x2f   :  { %v230_v4 = vpop.eup %229  ;;  %v132_v5 = vadd.f32 %v131_v63, %v129_v1  ;;  %v136_v6 = vmul.f32 %v228_v3, %v135_v0  ;;  %v154_v8 = vstv %s219_s17 }
  0x30   :  { %v139_v7 = vmul.f32 %v230_v4, %v138_v2  ;;  %v155_v10 = vmul.f32 %v228_v3, %v154_v8  ;;  %v157_v11 = vstv %s220_s18 }
  0x31   :  { %233 = vtanh.f32 %v132_v5  ;;  %v158_v13 = vmul.f32 %v230_v4, %v157_v11  ;;  %v161_v14 = vstv %s221_s19 }
  0x32   :  { %v140_v12 = vadd.f32 %v139_v7, %v136_v6  ;;  %v165_v20 = vstv %s222_s0 }
  0x33   :  { %v232_v15 = vpop.eup %231  ;;  %v159_v17 = vadd.f32 %v158_v13, %v155_v10  ;;  %v150_v26 = vstv %s218_s20 }
  0x34   :  { %v143_v16 = vmul.f32 %v232_v15, %v142_v9  ;;  %v162_v18 = vmul.f32 %v232_v15, %v161_v14  ;;  %v169_v27 = vstv %s223_s21 }
  0x36   :  { %v144_v21 = vadd.f32 %v143_v16, %v140_v12  ;;  %v163_v22 = vadd.f32 %v162_v18, %v159_v17 }
  0x37   :  { %v234_v23 = vpop.eup %233 }
  0x38   :  { %v147_v24 = vmul.f32 %v234_v23, %v146_v19  ;;  %v166_v25 = vmul.f32 %v234_v23, %v165_v20 }
  0x3a   :  { %v148_v28 = vadd.f32 %v147_v24, %v144_v21  ;;  %v167_v29 = vadd.f32 %v166_v25, %v163_v22 }
  0x3c   :  { %v151_v30 = vadd.f32 %v150_v26, %v148_v28  ;;  %v170_v31 = vadd.f32 %v169_v27, %v167_v29 }
  0x3e   :  { %152 = vst [vmem:[#allocation7] sm:$0x1] %v151_v30 }
  0x3f   :  { %171 = vst [vmem:[#allocation7 + $0x1] sm:$0x1] %v170_v31 }
  0x40   :  { %182 = dma.vmem_to_hbm [thread:$0]  %s178_s22, 32, %s180_s25, [#allocation4]  }
  0x41   :  { %299 = dma.done.wait [#allocation4], 32  }
  0x42   :  { %300 = vsyncadd [#allocation4], 4294967264 }
  0x43   :  { %187 = vsyncpa [#allocation3], 1 }
  0x44   :  { %188 = vsyncpa [#allocation4], 1 }
  0x45   :  { %189 = vsyncpa [#allocation5], 1 }

</bundles_post_ra>
